<compile_context>
chip_gen: v6e
topology: v6e:2x2x1
jax: 0.10.0
libtpu: 0.0.40
codegen_flags: <defaults>
</compile_context>

<pallas_src>
import jax
import jax.numpy as jnp
from jax.experimental import pallas as pl
from jax.experimental.pallas import tpu as pltpu


# ----------------------------------------------------------------------------
# Kernels: y = x @ Wc + bc, with Wc/bc packed into p_ref = [wc0..wc3, bc, 0,0,0]
# ----------------------------------------------------------------------------
def _fused_kernel_single(p_ref, x_ref, o_ref):
    p = p_ref[...]                       # (1, 8) packed params (resident)
    wc = p[:, 0:4]                       # (1, 4) folded weight row
    bc = p[:, 4:5]                       # (1, 1) folded bias
    x = x_ref[...].astype(jnp.float32)   # (TILE_B, 4)
    # VPU broadcast-multiply + XLU lane reduce (no MXU pass for K=4).
    y = jnp.sum(x * wc, axis=-1, keepdims=True) + bc
    o_ref[...] = y.astype(o_ref.dtype)


def _fused_kernel_dual(p_ref, x1_ref, x2_ref, o_ref):
    p = p_ref[...]
    wc = p[:, 0:4]
    bc = p[:, 4:5]
    # Affine layer => averaging inputs == averaging first-layer outputs.
    xm = 0.5 * (x1_ref[...].astype(jnp.float32) + x2_ref[...].astype(jnp.float32))
    y = jnp.sum(xm * wc, axis=-1, keepdims=True) + bc
    o_ref[...] = y.astype(o_ref.dtype)


# ----------------------------------------------------------------------------
# Wrapper
# ----------------------------------------------------------------------------
def _choose_tile(B):
    # Largest power-of-two tile (multiple of 8 f32 sublanes) that divides B,
    # capped well below VMEM limits even on v7x (64 MiB physical).
    for t in (2048, 1024, 512, 256, 128, 64, 32, 16, 8):
        if B % t == 0:
            return t
    return B  # tiny/odd batch: single full-array block (allowed by Mosaic)


def _fold_params(params):
    """Fold Linear(4,2) + Linear(2,1) into one (1,8) packed param tile."""
    w1, b1, w2, b2 = params              # (4,2) (1,2) (2,1) (1,1), x@W layout
    wc_row = (w1 @ w2).T                 # (1, 4)
    bc = b1 @ w2 + b2                    # (1, 1)
    pad = jnp.zeros((1, 3), jnp.float32)
    return jnp.concatenate([wc_row, bc, pad], axis=1).astype(jnp.float32)  # (1, 8)


def temp_debug_forward(params, input1, input2=None):
    """Pallas implementation of TempDebug.forward."""
    packed = _fold_params(params)
    B, F = input1.shape
    tile_b = _choose_tile(B)
    grid = (B // tile_b,) if B % tile_b == 0 else (1,)
    if B % tile_b != 0:
        tile_b = B

    param_spec = pl.BlockSpec((1, 8), lambda i: (0, 0))          # resident
    x_spec = pl.BlockSpec((tile_b, F), lambda i: (i, 0))
    # TODO(synk): output is lane-width 1 (masked stores); for very large B a
    # lane-dense (B,) layout reshaped outside the kernel would store faster.
    o_spec = pl.BlockSpec((tile_b, 1), lambda i: (i, 0))
    out_shape = jax.ShapeDtypeStruct((B, 1), jnp.float32)
    cparams = pltpu.CompilerParams(dimension_semantics=("parallel",))

    if input2 is None:
        return pl.pallas_call(
            _fused_kernel_single,
            out_shape=out_shape,
            grid=grid,
            in_specs=[param_spec, x_spec],
            out_specs=o_spec,
            compiler_params=cparams,
        )(packed, input1)
    else:
        return pl.pallas_call(
            _fused_kernel_dual,
            out_shape=out_shape,
            grid=grid,
            in_specs=[param_spec, x_spec, x_spec],
            out_specs=o_spec,
            compiler_params=cparams,
        )(packed, input1, input2)


# ----------------------------------------------------------------------------
# Params + reference
# ----------------------------------------------------------------------------
def init_params(key):
    """Deterministic params matching nn.Linear(4,2) and nn.Linear(2,1).

    PyTorch stores weight as (out, in); we store the transpose (in, out) so
    the math is x @ W + b.
    """
    k1, k2, k3, k4 = jax.random.split(key, 4)
    lim1 = 1.0 / jnp.sqrt(4.0)
    lim2 = 1.0 / jnp.sqrt(2.0)
    w1 = jax.random.uniform(k1, (4, 2), jnp.float32, -lim1, lim1)
    b1 = jax.random.uniform(k2, (1, 2), jnp.float32, -lim1, lim1)
    w2 = jax.random.uniform(k3, (2, 1), jnp.float32, -lim2, lim2)
    b2 = jax.random.uniform(k4, (1, 1), jnp.float32, -lim2, lim2)
    return w1, b1, w2, b2


def temp_debug_reference(params, input1, input2=None):
    """Pure-JAX reference (unfused, matching the PyTorch module exactly)."""
    w1, b1, w2, b2 = params
    if input2 is None:
        out1 = input1 @ w1 + b1
    else:
        out1 = 0.5 * (input1 @ w1 + b1) + 0.5 * (input2 @ w1 + b1)
    return out1 @ w2 + b2


if __name__ == "__main__":
    key = jax.random.PRNGKey(0)
    kp, kx1, kx2 = jax.random.split(key, 3)

    params = init_params(kp)

    B = 8  # small batch; feature dim = 4 per the module
    x1 = jax.random.normal(kx1, (B, 4), jnp.float32)
    x2 = jax.random.normal(kx2, (B, 4), jnp.float32)

    # Branch 1: single input
    y_single = jax.block_until_ready(temp_debug_forward(params, x1))
    ref_single = temp_debug_reference(params, x1)

    # Branch 2: two inputs (averaged first-layer outputs)
    y_dual = jax.block_until_ready(temp_debug_forward(params, x1, x2))
    ref_dual = temp_debug_reference(params, x1, x2)

    assert y_single.shape == (B, 1) and y_dual.shape == (B, 1)
    assert jnp.allclose(y_single, ref_single, atol=1e-5, rtol=1e-5)
    assert jnp.allclose(y_dual, ref_dual, atol=1e-5, rtol=1e-5)

    print("KERNEL_OK")
</pallas_src>

<mosaic_0001>
module attributes {stable_mosaic.version = 11 : i64} {
  func.func @_fused_kernel_single(%arg0: i32, %arg1: memref<1x8xf32, #tpu.memory_space<vmem>>, %arg2: memref<8x4xf32, #tpu.memory_space<vmem>>, %arg3: memref<8x1xf32, #tpu.memory_space<vmem>>) attributes {dimension_semantics = [#tpu.dimension_semantics<parallel>], iteration_bounds = array<i64: 1>, scalar_prefetch = 0 : i64, scratch_operands = 0 : i64, tpu.core_type = #tpu.core_type<tc>, window_params = [{pipeline_mode = #tpu.pipeline_mode<synchronous>, transform_indices = @transform_0, window_bounds = array<i64: 1, 8>}, {transform_indices = @transform_1, window_bounds = array<i64: 8, 4>}, {transform_indices = @transform_2, window_bounds = array<i64: 8, 1>}]} {
    %c0 = arith.constant 0 : index
    %c0_0 = arith.constant 0 : index
    %0 = vector.load %arg1[%c0, %c0_0] : memref<1x8xf32, #tpu.memory_space<vmem>>, vector<1x8xf32>
    %1 = vector.extract_strided_slice %0 {offsets = [0, 0], sizes = [1, 4], strides = [1, 1]} : vector<1x8xf32> to vector<1x4xf32>
    %2 = vector.extract_strided_slice %0 {offsets = [0, 4], sizes = [1, 1], strides = [1, 1]} : vector<1x8xf32> to vector<1x1xf32>
    %c0_1 = arith.constant 0 : index
    %c0_2 = arith.constant 0 : index
    %3 = vector.load %arg2[%c0_1, %c0_2] : memref<8x4xf32, #tpu.memory_space<vmem>>, vector<8x4xf32>
    %4 = vector.broadcast %1 : vector<1x4xf32> to vector<8x4xf32>
    %5 = arith.mulf %3, %4 : vector<8x4xf32>
    %cst = arith.constant dense<0.000000e+00> : vector<8xf32>
    %6 = vector.multi_reduction <add>, %5, %cst [1] : vector<8x4xf32> to vector<8xf32>
    %7 = vector.shape_cast %6 : vector<8xf32> to vector<8x1xf32>
    %8 = vector.broadcast %2 : vector<1x1xf32> to vector<8x1xf32>
    %9 = arith.addf %7, %8 : vector<8x1xf32>
    %c0_3 = arith.constant 0 : index
    %c0_4 = arith.constant 0 : index
    %10 = vector.load %arg3[%c0_3, %c0_4] : memref<8x1xf32, #tpu.memory_space<vmem>>, vector<8x1xf32>
    tpu.vector_store %arg3[%c0_3, %c0_4], %9 {strides = array<i32>} : memref<8x1xf32, #tpu.memory_space<vmem>>, vector<8x1xf32>,
    return
  }
  func.func @transform_0(%arg0: i32) -> (i32, i32) {
    %c0_i32 = arith.constant 0 : i32
    %c0_i32_0 = arith.constant 0 : i32
    %c0_i32_1 = arith.constant 0 : i32
    return %c0_i32, %c0_i32_0 : i32, i32
  }
  func.func @transform_1(%arg0: i32) -> (i32, i32) {
    %c0_i32 = arith.constant 0 : i32
    %c0_i32_0 = arith.constant 0 : i32
    return %arg0, %c0_i32 : i32, i32
  }
  func.func @transform_2(%arg0: i32) -> (i32, i32) {
    %c0_i32 = arith.constant 0 : i32
    %c0_i32_0 = arith.constant 0 : i32
    return %arg0, %c0_i32 : i32, i32
  }
}

</mosaic_0001>

<bundles_post_ra>
// kernel: tpu_custom_call.1
= control target key start
LH: loop header
LB: loop body
LE: loop exit
PB: predicated region body
PF: predicated region fallthrough
CT: control target
= control target key end

     0   :  { %vm20_vm0 = vcmask 31744   ;;  %s37_s13 = smov 124   ;;  %vm29_vm1 = vcmask 7168   ;;  %s62_s0 = inlined_call_operand.vmem [shape: f32[1,8], index: 0, kind: input, shape index: {}]   ;;  %s63_s1 = inlined_call_operand.vmem [shape: f32[8,4], index: 1, kind: input, shape index: {}]   ;;  %s64_s2 = inlined_call_operand.vmem [shape: f32[8,1], index: 2, kind: output, shape index: {}]  }
   0x1   :  { %v35_v0 = vld [vmem:[%s62_s0] ss:$0 sm:$0xff] }
   0x2   :  { %v12_v1 = vld [vmem:[%s63_s1] sm:$0xff] }
   0x3   :  { %v19_v2 = vmul.f32 %v35_v0, %v12_v1 }
   0x5   :  { %v21_v3 = vsel %vm20_vm0, %v19_v2, 0.0 }
   0x6   :  { %22 = vadd.xlane.f32.xlu0 %v21_v3 }
  0x8f   :  { %v23_v4 = vpop.xlane.xlu0 %22 }
  0x90   :  { %v24_v5 = vadd.f32 %v35_v0, %v23_v4 }
  0x92   :  { %26 = vrot.lane.b32.xlu0 %v24_v5, %s37_s13 }
 0x104   :  { %v27_v6 = vpop.permute.xlu0 %26 }
 0x105   :  { %30 = vst.msk [vmem:[%s64_s2] sm:$0xff] %vm29_vm1, %v27_v6 }

</bundles_post_ra>
